<compile_context>
chip_gen: v5e
topology: v5e:2x2
jax: 0.10.0
libtpu: 0.0.40
codegen_flags: <defaults>
</compile_context>

<pallas_src>
import functools

import numpy as np
import jax
import jax.numpy as jnp
from jax import lax
from jax.experimental import pallas as pl
from jax.experimental.pallas import tpu as pltpu

# ---- "pose_config.json" values, set deterministically in-script ---------------
SIGMA = 1.0          # gaussian sigma
THRESHOLD = 0.3      # model_threshold
PAF_OUTPUT = 2       # index of last PAF stage in the model output list
UPSCALE = True       # -> GaussianBlur(kernel_size=(5,5), sigma=(SIGMA, SIGMA))

KSIZE = 5
PAD = KSIZE // 2


def _gaussian_kernel1d(ksize: int, sigma: float) -> np.ndarray:
    # Mirrors torchvision.transforms.functional._get_gaussian_kernel1d.
    half = (ksize - 1) * 0.5
    x = np.linspace(-half, half, ksize)
    pdf = np.exp(-0.5 * (x / sigma) ** 2)
    return (pdf / pdf.sum()).astype(np.float32)


G1D = _gaussian_kernel1d(KSIZE, SIGMA)          # symmetric: [c2, c1, c0, c1, c2]
C0 = float(G1D[2])
C1 = float(G1D[1])
C2 = float(G1D[0])


# ------------------------------ in-kernel helpers -------------------------------
def _seg_index(shape, axis, period):
    """Within-segment index along `axis` (segments of length `period`)."""
    idx = lax.broadcasted_iota(jnp.int32, shape, axis)
    if period == shape[axis]:
        return idx
    if (period & (period - 1)) == 0:            # power of two: cheap bitwise and
        return jnp.bitwise_and(idx, period - 1)
    return idx % period  # TODO(synk): non-power-of-two W relies on vector int rem


def _blur5_reflect(x, axis, period):
    """Separable 5-tap Gaussian along `axis` with reflect padding, applied
    independently to each contiguous segment of length `period`.
    Edge columns/rows use reflect-folded weights, which also overwrites any
    cross-segment bleed from the global rolls."""
    n = x.shape[axis]
    w = _seg_index(x.shape, axis, period)
    m1 = pltpu.roll(x, 1, axis=axis)            # x[i-1]
    m2 = pltpu.roll(x, 2, axis=axis)            # x[i-2]
    p1 = pltpu.roll(x, n - 1, axis=axis)        # x[i+1]
    p2 = pltpu.roll(x, n - 2, axis=axis)        # x[i+2]

    base = C0 * x + C1 * (m1 + p1) + C2 * (m2 + p2)

    first = w == 0
    second = w == 1
    penult = w == period - 2
    last = w == period - 1

    # i == 0 / period-1 : c0*x0 + 2*c1*x1 + 2*c2*x2   (mirrored at the far end)
    outer = (C0 * x
             + (2.0 * C1) * jnp.where(first, p1, m1)
             + (2.0 * C2) * jnp.where(first, p2, m2))
    # i == 1 / period-2 : c1*x0 + (c0+c2)*x1 + c1*x2 + c2*x3   (mirrored)
    inner = ((C0 + C2) * x + C1 * (m1 + p1)
             + C2 * jnp.where(second, p2, m2))

    out = jnp.where(second | penult, inner, base)
    return jnp.where(first | last, outer, out)


def _maxpool3_reflectless(x, axis, period):
    """3-wide max, stride 1, pad 1 along `axis`, per segment of length `period`.
    Replicating the edge value is equivalent to -inf padding for max."""
    n = x.shape[axis]
    w = _seg_index(x.shape, axis, period)
    m1 = pltpu.roll(x, 1, axis=axis)            # x[i-1]
    p1 = pltpu.roll(x, n - 1, axis=axis)        # x[i+1]
    m1 = jnp.where(w == 0, x, m1)               # no left neighbor at segment start
    p1 = jnp.where(w == period - 1, x, p1)      # no right neighbor at segment end
    return jnp.maximum(x, jnp.maximum(m1, p1))


# -------------------------------- Pallas kernel ---------------------------------
def _peaks_kernel(x_ref, o_ref, *, H, W, threshold):
    # x_ref: (H, lane_tile) f32 — planes packed along lanes in W-wide segments.
    x = x_ref[...]
    bh = _blur5_reflect(x, axis=1, period=W)        # horizontal 1D Gaussian
    blur = _blur5_reflect(bh, axis=0, period=H)     # vertical 1D Gaussian
    mp = _maxpool3_reflectless(blur, axis=1, period=W)
    mp = _maxpool3_reflectless(mp, axis=0, period=H)
    # non-max suppression + threshold (the torch.where chain, fused)
    peaks_map = jnp.where((blur == mp) & (blur > threshold), blur, 0.0)
    o_ref[...] = peaks_map


# ------------------------------- wrapper (glue) ----------------------------------
def _pick_lane_tile(L, W):
    # Single block for small maps; for large fused maps, segment- & vreg-aligned
    # lane tiles so the (parallel) grid can be sharded across TensorCores and
    # stay inside v7x's 64 MiB VMEM.
    unit = int(np.lcm(W, 128))
    if L <= 2048 or L % unit != 0:
        return L
    tile = unit * max(1, 2048 // unit)
    while L % tile:
        tile -= unit
    return tile


def skeleton_postprocess(original_heat: jax.Array, *, threshold: float = THRESHOLD):
    """original_heat: (N, C, H, W) f32. Returns peaks_map (N, C, H, W) f32."""
    N, C, H, W = original_heat.shape
    assert H >= 4 and W >= 4, "reflect-folded 5-tap blur needs >= 4 pixels per axis"
    NC = N * C
    L = NC * W

    # Lane-dense packing: (N, C, H, W) -> (H, N*C*W). Pure layout plumbing; no
    # HBM-side reflect pad is materialized (reflect handled inside the kernel).
    x = (original_heat.astype(jnp.float32)
         .reshape(NC, H, W).transpose(1, 0, 2).reshape(H, L))

    lane_tile = _pick_lane_tile(L, W)
    grid = (L // lane_tile,)

    kernel = functools.partial(_peaks_kernel, H=H, W=W, threshold=float(threshold))
    packed = pl.pallas_call(
        kernel,
        out_shape=jax.ShapeDtypeStruct((H, L), jnp.float32),
        grid_spec=pltpu.PrefetchScalarGridSpec(
            num_scalar_prefetch=0,
            grid=grid,
            in_specs=[pl.BlockSpec((H, lane_tile), lambda i: (0, i))],
            out_specs=pl.BlockSpec((H, lane_tile), lambda i: (0, i)),
        ),
        compiler_params=pltpu.CompilerParams(
            dimension_semantics=("parallel",)),
    )(x)

    # Unpack back to NCHW for downstream (host-side) consumers.
    return (packed.reshape(H, NC, W).transpose(1, 0, 2).reshape(N, C, H, W))


@jax.jit
def skeleton_estimator_forward(original_paf, original_heat, prev_paf):
    """Mirrors SkeletonEstimator.forward on the tensor path.

    original_paf  ~ outputs[self.paf_output]
    original_heat ~ outputs[-1]
    prev_paf      ~ outputs[self.paf_output - 1]
    """
    # TODO(synk): PoseNet backbone class/weights are not provided; its stage
    # outputs are taken as inputs here instead of being recomputed.
    peaks_map = skeleton_postprocess(original_heat, threshold=THRESHOLD)
    # TODO(synk): torch.nonzero + Joint / InferenceSkeletons construction is
    # dynamic-shape, host-side Python object building with no Pallas equivalent;
    # peaks_map carries the peak coordinates and confidences needed to build them
    # (confidences == maxes at peak locations == peaks_map values).
    return peaks_map, original_paf, original_heat, prev_paf


# ----------------------------------- main -----------------------------------------
if __name__ == "__main__":
    key = jax.random.PRNGKey(0)
    N, C, H, W = 2, 4, 16, 16   # batch, heat channels (joint types), spatial
    P = 8                       # paf channels
    k1, k2, k3 = jax.random.split(key, 3)

    original_heat = jax.random.uniform(k1, (N, C, H, W), jnp.float32)
    original_paf = jax.random.uniform(k2, (N, P, H, W), jnp.float32, -1.0, 1.0)
    prev_paf = jax.random.uniform(k3, (N, P, H, W), jnp.float32, -1.0, 1.0)

    peaks_map, _, _, _ = skeleton_estimator_forward(
        original_paf, original_heat, prev_paf)
    peaks_map = jax.block_until_ready(peaks_map)

    # ---- pure-JAX reference (torchvision GaussianBlur + nn.MaxPool2d semantics) --
    g2d = np.outer(G1D, G1D)
    hp = jnp.pad(original_heat, ((0, 0), (0, 0), (PAD, PAD), (PAD, PAD)),
                 mode="reflect")
    ref_blur = jnp.zeros((N, C, H, W), jnp.float32)
    for a in range(KSIZE):
        for b in range(KSIZE):
            ref_blur = ref_blur + float(g2d[a, b]) * hp[:, :, a:a + H, b:b + W]
    mb = jnp.pad(ref_blur, ((0, 0), (0, 0), (1, 1), (1, 1)),
                 constant_values=-jnp.inf)
    ref_nbr = jnp.full((N, C, H, W), -jnp.inf, jnp.float32)   # max over 8 neighbors
    for di in range(3):
        for dj in range(3):
            if di == 1 and dj == 1:
                continue
            ref_nbr = jnp.maximum(ref_nbr, mb[:, :, di:di + H, dj:dj + W])
    ref_max = jnp.maximum(ref_nbr, ref_blur)
    ref_peaks = jnp.where(ref_blur == ref_max, ref_blur, 0.0)
    ref_pm = jnp.where(ref_peaks > THRESHOLD, ref_peaks, 0.0)

    got = np.asarray(peaks_map)
    ref = np.asarray(ref_pm)
    rb = np.asarray(ref_blur)
    rnbr = np.asarray(ref_nbr)

    mismatch = ~np.isclose(got, ref, rtol=1e-5, atol=1e-5)
    # Separable (kernel) vs direct 2D (reference) blur can differ in the last ulp;
    # only allow deviations where the NMS / threshold decision is itself a
    # float-level tie.
    decision_tie = (np.abs(rb - rnbr) <= 1e-5) | (np.abs(rb - THRESHOLD) <= 1e-5)
    assert not np.any(mismatch & ~decision_tie), "peaks_map mismatch vs reference"
    assert np.all((got == 0) | (got > THRESHOLD)), "threshold violated"

    print("KERNEL_OK")
</pallas_src>

<mosaic_0001>
module attributes {stable_mosaic.version = 11 : i64} {
  func.func @_peaks_kernel(%arg0: i32, %arg1: memref<16x128xf32, #tpu.memory_space<vmem>>, %arg2: memref<16x128xf32, #tpu.memory_space<vmem>>) attributes {dimension_semantics = [#tpu.dimension_semantics<parallel>], iteration_bounds = array<i64: 1>, scalar_prefetch = 0 : i64, scratch_operands = 0 : i64, tpu.core_type = #tpu.core_type<tc>, window_params = [{transform_indices = @transform_0, window_bounds = array<i64: 16, 128>}, {transform_indices = @transform_1, window_bounds = array<i64: 16, 128>}]} {
    %c0 = arith.constant 0 : index
    %c0_0 = arith.constant 0 : index
    %0 = vector.load %arg1[%c0, %c0_0] : memref<16x128xf32, #tpu.memory_space<vmem>>, vector<16x128xf32>
    %1 = tpu.iota {dimensions = array<i32: 1>} : vector<16x128xi32>
    %c15_i32 = arith.constant 15 : i32
    %2 = vector.broadcast %c15_i32 : i32 to vector<16x128xi32>
    %3 = arith.andi %1, %2 : vector<16x128xi32>
    %c1_i32 = arith.constant 1 : i32
    %4 = tpu.dynamic_rotate %0 by %c1_i32 dim 1 : vector<16x128xf32>, i32 -> vector<16x128xf32>
    %c2_i32 = arith.constant 2 : i32
    %5 = tpu.dynamic_rotate %0 by %c2_i32 dim 1 : vector<16x128xf32>, i32 -> vector<16x128xf32>
    %c127_i32 = arith.constant 127 : i32
    %6 = tpu.dynamic_rotate %0 by %c127_i32 dim 1 : vector<16x128xf32>, i32 -> vector<16x128xf32>
    %c126_i32 = arith.constant 126 : i32
    %7 = tpu.dynamic_rotate %0 by %c126_i32 dim 1 : vector<16x128xf32>, i32 -> vector<16x128xf32>
    %cst = arith.constant 0.402619958 : f32
    %8 = vector.broadcast %cst : f32 to vector<16x128xf32>
    %9 = arith.mulf %8, %0 : vector<16x128xf32>
    %10 = arith.addf %4, %6 : vector<16x128xf32>
    %cst_1 = arith.constant 0.244201347 : f32
    %11 = vector.broadcast %cst_1 : f32 to vector<16x128xf32>
    %12 = arith.mulf %11, %10 : vector<16x128xf32>
    %13 = arith.addf %9, %12 : vector<16x128xf32>
    %14 = arith.addf %5, %7 : vector<16x128xf32>
    %cst_2 = arith.constant 0.054488685 : f32
    %15 = vector.broadcast %cst_2 : f32 to vector<16x128xf32>
    %16 = arith.mulf %15, %14 : vector<16x128xf32>
    %17 = arith.addf %13, %16 : vector<16x128xf32>
    %c0_i32 = arith.constant 0 : i32
    %18 = vector.broadcast %c0_i32 : i32 to vector<16x128xi32>
    %19 = arith.cmpi eq, %3, %18 : vector<16x128xi32>
    %c1_i32_3 = arith.constant 1 : i32
    %20 = vector.broadcast %c1_i32_3 : i32 to vector<16x128xi32>
    %21 = arith.cmpi eq, %3, %20 : vector<16x128xi32>
    %c14_i32 = arith.constant 14 : i32
    %22 = vector.broadcast %c14_i32 : i32 to vector<16x128xi32>
    %23 = arith.cmpi eq, %3, %22 : vector<16x128xi32>
    %c15_i32_4 = arith.constant 15 : i32
    %24 = vector.broadcast %c15_i32_4 : i32 to vector<16x128xi32>
    %25 = arith.cmpi eq, %3, %24 : vector<16x128xi32>
    %cst_5 = arith.constant 0.402619958 : f32
    %26 = vector.broadcast %cst_5 : f32 to vector<16x128xf32>
    %27 = arith.mulf %26, %0 : vector<16x128xf32>
    %28 = arith.select %19, %6, %4 : vector<16x128xi1>, vector<16x128xf32>
    %cst_6 = arith.constant 0.488402694 : f32
    %29 = vector.broadcast %cst_6 : f32 to vector<16x128xf32>
    %30 = arith.mulf %29, %28 : vector<16x128xf32>
    %31 = arith.addf %27, %30 : vector<16x128xf32>
    %32 = arith.select %19, %7, %5 : vector<16x128xi1>, vector<16x128xf32>
    %cst_7 = arith.constant 0.10897737 : f32
    %33 = vector.broadcast %cst_7 : f32 to vector<16x128xf32>
    %34 = arith.mulf %33, %32 : vector<16x128xf32>
    %35 = arith.addf %31, %34 : vector<16x128xf32>
    %cst_8 = arith.constant 0.457108647 : f32
    %36 = vector.broadcast %cst_8 : f32 to vector<16x128xf32>
    %37 = arith.mulf %36, %0 : vector<16x128xf32>
    %38 = arith.addf %4, %6 : vector<16x128xf32>
    %cst_9 = arith.constant 0.244201347 : f32
    %39 = vector.broadcast %cst_9 : f32 to vector<16x128xf32>
    %40 = arith.mulf %39, %38 : vector<16x128xf32>
    %41 = arith.addf %37, %40 : vector<16x128xf32>
    %42 = arith.select %21, %7, %5 : vector<16x128xi1>, vector<16x128xf32>
    %cst_10 = arith.constant 0.054488685 : f32
    %43 = vector.broadcast %cst_10 : f32 to vector<16x128xf32>
    %44 = arith.mulf %43, %42 : vector<16x128xf32>
    %45 = arith.addf %41, %44 : vector<16x128xf32>
    %46 = arith.ori %21, %23 : vector<16x128xi1>
    %47 = arith.select %46, %45, %17 : vector<16x128xi1>, vector<16x128xf32>
    %48 = arith.ori %19, %25 : vector<16x128xi1>
    %49 = arith.select %48, %35, %47 : vector<16x128xi1>, vector<16x128xf32>
    %50 = tpu.iota {dimensions = array<i32: 0>} : vector<16x128xi32>
    %c1_i32_11 = arith.constant 1 : i32
    %51 = tpu.dynamic_rotate %49 by %c1_i32_11 dim 0 : vector<16x128xf32>, i32 -> vector<16x128xf32>
    %c2_i32_12 = arith.constant 2 : i32
    %52 = tpu.dynamic_rotate %49 by %c2_i32_12 dim 0 : vector<16x128xf32>, i32 -> vector<16x128xf32>
    %c15_i32_13 = arith.constant 15 : i32
    %53 = tpu.dynamic_rotate %49 by %c15_i32_13 dim 0 : vector<16x128xf32>, i32 -> vector<16x128xf32>
    %c14_i32_14 = arith.constant 14 : i32
    %54 = tpu.dynamic_rotate %49 by %c14_i32_14 dim 0 : vector<16x128xf32>, i32 -> vector<16x128xf32>
    %cst_15 = arith.constant 0.402619958 : f32
    %55 = vector.broadcast %cst_15 : f32 to vector<16x128xf32>
    %56 = arith.mulf %55, %49 : vector<16x128xf32>
    %57 = arith.addf %51, %53 : vector<16x128xf32>
    %cst_16 = arith.constant 0.244201347 : f32
    %58 = vector.broadcast %cst_16 : f32 to vector<16x128xf32>
    %59 = arith.mulf %58, %57 : vector<16x128xf32>
    %60 = arith.addf %56, %59 : vector<16x128xf32>
    %61 = arith.addf %52, %54 : vector<16x128xf32>
    %cst_17 = arith.constant 0.054488685 : f32
    %62 = vector.broadcast %cst_17 : f32 to vector<16x128xf32>
    %63 = arith.mulf %62, %61 : vector<16x128xf32>
    %64 = arith.addf %60, %63 : vector<16x128xf32>
    %c0_i32_18 = arith.constant 0 : i32
    %65 = vector.broadcast %c0_i32_18 : i32 to vector<16x128xi32>
    %66 = arith.cmpi eq, %50, %65 : vector<16x128xi32>
    %c1_i32_19 = arith.constant 1 : i32
    %67 = vector.broadcast %c1_i32_19 : i32 to vector<16x128xi32>
    %68 = arith.cmpi eq, %50, %67 : vector<16x128xi32>
    %c14_i32_20 = arith.constant 14 : i32
    %69 = vector.broadcast %c14_i32_20 : i32 to vector<16x128xi32>
    %70 = arith.cmpi eq, %50, %69 : vector<16x128xi32>
    %c15_i32_21 = arith.constant 15 : i32
    %71 = vector.broadcast %c15_i32_21 : i32 to vector<16x128xi32>
    %72 = arith.cmpi eq, %50, %71 : vector<16x128xi32>
    %cst_22 = arith.constant 0.402619958 : f32
    %73 = vector.broadcast %cst_22 : f32 to vector<16x128xf32>
    %74 = arith.mulf %73, %49 : vector<16x128xf32>
    %75 = arith.select %66, %53, %51 : vector<16x128xi1>, vector<16x128xf32>
    %cst_23 = arith.constant 0.488402694 : f32
    %76 = vector.broadcast %cst_23 : f32 to vector<16x128xf32>
    %77 = arith.mulf %76, %75 : vector<16x128xf32>
    %78 = arith.addf %74, %77 : vector<16x128xf32>
    %79 = arith.select %66, %54, %52 : vector<16x128xi1>, vector<16x128xf32>
    %cst_24 = arith.constant 0.10897737 : f32
    %80 = vector.broadcast %cst_24 : f32 to vector<16x128xf32>
    %81 = arith.mulf %80, %79 : vector<16x128xf32>
    %82 = arith.addf %78, %81 : vector<16x128xf32>
    %cst_25 = arith.constant 0.457108647 : f32
    %83 = vector.broadcast %cst_25 : f32 to vector<16x128xf32>
    %84 = arith.mulf %83, %49 : vector<16x128xf32>
    %85 = arith.addf %51, %53 : vector<16x128xf32>
    %cst_26 = arith.constant 0.244201347 : f32
    %86 = vector.broadcast %cst_26 : f32 to vector<16x128xf32>
    %87 = arith.mulf %86, %85 : vector<16x128xf32>
    %88 = arith.addf %84, %87 : vector<16x128xf32>
    %89 = arith.select %68, %54, %52 : vector<16x128xi1>, vector<16x128xf32>
    %cst_27 = arith.constant 0.054488685 : f32
    %90 = vector.broadcast %cst_27 : f32 to vector<16x128xf32>
    %91 = arith.mulf %90, %89 : vector<16x128xf32>
    %92 = arith.addf %88, %91 : vector<16x128xf32>
    %93 = arith.ori %68, %70 : vector<16x128xi1>
    %94 = arith.select %93, %92, %64 : vector<16x128xi1>, vector<16x128xf32>
    %95 = arith.ori %66, %72 : vector<16x128xi1>
    %96 = arith.select %95, %82, %94 : vector<16x128xi1>, vector<16x128xf32>
    %97 = tpu.iota {dimensions = array<i32: 1>} : vector<16x128xi32>
    %c15_i32_28 = arith.constant 15 : i32
    %98 = vector.broadcast %c15_i32_28 : i32 to vector<16x128xi32>
    %99 = arith.andi %97, %98 : vector<16x128xi32>
    %c1_i32_29 = arith.constant 1 : i32
    %100 = tpu.dynamic_rotate %96 by %c1_i32_29 dim 1 : vector<16x128xf32>, i32 -> vector<16x128xf32>
    %c127_i32_30 = arith.constant 127 : i32
    %101 = tpu.dynamic_rotate %96 by %c127_i32_30 dim 1 : vector<16x128xf32>, i32 -> vector<16x128xf32>
    %c0_i32_31 = arith.constant 0 : i32
    %102 = vector.broadcast %c0_i32_31 : i32 to vector<16x128xi32>
    %103 = arith.cmpi eq, %99, %102 : vector<16x128xi32>
    %104 = arith.select %103, %96, %100 : vector<16x128xi1>, vector<16x128xf32>
    %c15_i32_32 = arith.constant 15 : i32
    %105 = vector.broadcast %c15_i32_32 : i32 to vector<16x128xi32>
    %106 = arith.cmpi eq, %99, %105 : vector<16x128xi32>
    %107 = arith.select %106, %96, %101 : vector<16x128xi1>, vector<16x128xf32>
    %108 = arith.maximumf %104, %107 : vector<16x128xf32>
    %109 = arith.maximumf %96, %108 : vector<16x128xf32>
    %110 = tpu.iota {dimensions = array<i32: 0>} : vector<16x128xi32>
    %c1_i32_33 = arith.constant 1 : i32
    %111 = tpu.dynamic_rotate %109 by %c1_i32_33 dim 0 : vector<16x128xf32>, i32 -> vector<16x128xf32>
    %c15_i32_34 = arith.constant 15 : i32
    %112 = tpu.dynamic_rotate %109 by %c15_i32_34 dim 0 : vector<16x128xf32>, i32 -> vector<16x128xf32>
    %c0_i32_35 = arith.constant 0 : i32
    %113 = vector.broadcast %c0_i32_35 : i32 to vector<16x128xi32>
    %114 = arith.cmpi eq, %110, %113 : vector<16x128xi32>
    %115 = arith.select %114, %109, %111 : vector<16x128xi1>, vector<16x128xf32>
    %c15_i32_36 = arith.constant 15 : i32
    %116 = vector.broadcast %c15_i32_36 : i32 to vector<16x128xi32>
    %117 = arith.cmpi eq, %110, %116 : vector<16x128xi32>
    %118 = arith.select %117, %109, %112 : vector<16x128xi1>, vector<16x128xf32>
    %119 = arith.maximumf %115, %118 : vector<16x128xf32>
    %120 = arith.maximumf %109, %119 : vector<16x128xf32>
    %121 = arith.cmpf oeq, %96, %120 : vector<16x128xf32>
    %cst_37 = arith.constant 3.000000e-01 : f32
    %122 = vector.broadcast %cst_37 : f32 to vector<16x128xf32>
    %123 = arith.cmpf ogt, %96, %122 : vector<16x128xf32>
    %124 = arith.andi %121, %123 : vector<16x128xi1>
    %cst_38 = arith.constant 0.000000e+00 : f32
    %125 = vector.broadcast %cst_38 : f32 to vector<16x128xf32>
    %126 = arith.select %124, %96, %125 : vector<16x128xi1>, vector<16x128xf32>
    %c0_39 = arith.constant 0 : index
    %c0_40 = arith.constant 0 : index
    %127 = vector.load %arg2[%c0_39, %c0_40] : memref<16x128xf32, #tpu.memory_space<vmem>>, vector<16x128xf32>
    tpu.vector_store %arg2[%c0_39, %c0_40], %126 {strides = array<i32>} : memref<16x128xf32, #tpu.memory_space<vmem>>, vector<16x128xf32>,
    return
  }
  func.func @transform_0(%arg0: i32) -> (i32, i32) {
    %c0_i32 = arith.constant 0 : i32
    %c0_i32_0 = arith.constant 0 : i32
    return %c0_i32, %arg0 : i32, i32
  }
  func.func @transform_1(%arg0: i32) -> (i32, i32) {
    %c0_i32 = arith.constant 0 : i32
    %c0_i32_0 = arith.constant 0 : i32
    return %c0_i32, %arg0 : i32, i32
  }
}

</mosaic_0001>

<bundles_post_ra>
// kernel: skeleton_estimator_forward.1
= control target key start
LH: loop header
LB: loop body
LE: loop exit
PB: predicated region body
PF: predicated region fallthrough
CT: control target
= control target key end

     0   :  { %s200_s8 = smov 127   ;;  %s201_s9 = smov 1   ;;  %v10_v2 = vlaneseq  ;;  %s339_s0 = inlined_call_operand.vmem [shape: f32[16,128], index: 0, kind: input, shape index: {}]   ;;  %s340_s1 = inlined_call_operand.vmem [shape: f32[16,128], index: 1, kind: output, shape index: {}]  }
   0x1   :  { %v8_v0 = vld [vmem:[%s339_s0] sm:$0xff]  ;;  %s202_s10 = smov 2   ;;  %v9_v1 = vld [vmem:[%s339_s0 + $0x8] sm:$0xff]  ;;  %s203_s13 = smov 126  }
   0x2   :  { %21 = vrot.lane.b32.xlu1 %v8_v0, %s200_s8  ;;  %13 = vrot.lane.b32.xlu0 %v8_v0, %s201_s9  ;;  %v11_v5 = vand.u32 127, %v10_v2  ;;  %v29_v12 = vmul.f32 0.40261996, %v8_v0  ;;  %v60_v14 = vmul.f32 0.45710865, %v9_v1  ;;  %v231_v18 = vshrl.u32 %v10_v2, 7 }
   0x3   :  { %17 = vrot.lane.b32.xlu2 %v8_v0, %s202_s10  ;;  %v59_v20 = vmul.f32 0.45710865, %v8_v0  ;;  %v30_v21 = vmul.f32 0.40261996, %v9_v1 }
   0x4   :  { %v224_v7 = vand.u32 15, %v11_v5  ;;  %vm80_vm6 = vcmp.lt.s32.totalorder %v231_v18, 1  ;;  %vm85_vm7 = vcmp.lt.s32.totalorder %v231_v18, 2  ;;  %vm90_vm8 = vcmp.lt.s32.totalorder %v231_v18, 7 }
   0x5   :  { %v270_v57 = vadd.s32 8, %v231_v18  ;;  %vm95_vm9 = vcmp.lt.s32.totalorder %v231_v18, 6  ;;  %vm112_vm10 = vcmp.eq.s32.totalorder %v231_v18, 0  ;;  %vm114_vm11 = vcmp.eq.s32.totalorder %v231_v18, 1 }
   0x6   :  { %vm43_vm0 = vcmp.eq.s32.totalorder %v224_v7, 0  ;;  %vm44_vm1 = vcmp.eq.s32.totalorder %v224_v7, 1  ;;  %vm45_vm2 = vcmp.eq.s32.totalorder %v224_v7, 14  ;;  %vm46_vm3 = vcmp.eq.s32.totalorder %v224_v7, 15 }
   0x7   :  { %vm248_vm4 = vmor %vm44_vm1, %vm45_vm2  ;;  %vm117_vm12 = vcmp.eq.s32.totalorder %v270_v57, 14  ;;  %vm119_vm13 = vcmp.eq.s32.totalorder %v270_v57, 15 }
   0x8   :  { %vm256_vm5 = vmor %vm43_vm0, %vm46_vm3 }
   0xa   :  { %23 = vrot.lane.b32.xlu1 %v9_v1, %s200_s8  ;;  %15 = vrot.lane.b32.xlu0 %v9_v1, %s201_s9 }
   0xb   :  { %19 = vrot.lane.b32.xlu2 %v9_v1, %s202_s10 }
  0x12   :  { %27 = vrot.lane.b32.xlu1 %v9_v1, %s203_s13  ;;  %25 = vrot.lane.b32.xlu0 %v8_v0, %s203_s13 }
  0x5d   :  { %v18_v6 = vpop.permute.xlu2 %17 }
  0x65   :  { %v20_v19 = vpop.permute.xlu2 %19 }
  0x74   :  { %v22_v3 = vpop.permute.xlu1 %21  ;;  %v14_v4 = vpop.permute.xlu0 %13 }
  0x75   :  { %v31_v8 = vadd.f32 %v22_v3, %v14_v4  ;;  %v47_v16 = vsel %vm43_vm0, %v22_v3, %v14_v4 }
  0x76   :  { %v49_v23 = vmul.f32 0.4884027, %v47_v16 }
  0x77   :  { %v33_v13 = vmul.f32 0.24420135, %v31_v8 }
  0x78   :  { %v51_v48 = vadd.f32 %v49_v23, %v29_v12 }
  0x79   :  { %v35_v22 = vadd.f32 %v33_v13, %v29_v12  ;;  %v61_v36 = vadd.f32 %v59_v20, %v33_v13 }
  0x7c   :  { %v24_v9 = vpop.permute.xlu1 %23  ;;  %v16_v10 = vpop.permute.xlu0 %15 }
  0x7d   :  { %v32_v11 = vadd.f32 %v24_v9, %v16_v10  ;;  %v48_v17 = vsel %vm43_vm0, %v24_v9, %v16_v10 }
  0x7e   :  { %v50_v24 = vmul.f32 0.4884027, %v48_v17 }
  0x7f   :  { %v34_v15 = vmul.f32 0.24420135, %v32_v11 }
  0x80   :  { %v52_v40 = vadd.f32 %v50_v24, %v30_v21 }
  0x81   :  { %v62_v25 = vadd.f32 %v60_v14, %v34_v15  ;;  %v36_v37 = vadd.f32 %v34_v15, %v30_v21 }
  0x84   :  { %v28_v26 = vpop.permute.xlu1 %27  ;;  %v26_v27 = vpop.permute.xlu0 %25 }
  0x85   :  { %v38_v28 = vadd.f32 %v28_v26, %v20_v19  ;;  %v54_v29 = vsel %vm43_vm0, %v28_v26, %v20_v19  ;;  %v64_v30 = vsel %vm44_vm1, %v28_v26, %v20_v19  ;;  %v37_v31 = vadd.f32 %v26_v27, %v18_v6 }
  0x86   :  { %v56_v32 = vmul.f32 0.10897737, %v54_v29  ;;  %v66_v33 = vmul.f32 0.054488685, %v64_v30  ;;  %v53_v34 = vsel %vm43_vm0, %v26_v27, %v18_v6  ;;  %v63_v35 = vsel %vm44_vm1, %v26_v27, %v18_v6 }
  0x87   :  { %v40_v38 = vmul.f32 0.054488685, %v38_v28  ;;  %v39_v39 = vmul.f32 0.054488685, %v37_v31  ;;  %v55_v43 = vmul.f32 0.10897737, %v53_v34 }
  0x88   :  { %v68_v42 = vadd.f32 %v66_v33, %v62_v25  ;;  %v65_v44 = vmul.f32 0.054488685, %v63_v35  ;;  %v58_v49 = vadd.f32 %v56_v32, %v52_v40 }
  0x89   :  { %v42_v46 = vadd.f32 %v40_v38, %v36_v37  ;;  %v41_v47 = vadd.f32 %v39_v39, %v35_v22  ;;  %v57_v53 = vadd.f32 %v55_v43, %v51_v48 }
  0x8a   :  { %v67_v50 = vadd.f32 %v65_v44, %v61_v36 }
  0x8b   :  { %v71_v51 = vsel %vm248_vm4, %v68_v42, %v42_v46 }
  0x8c   :  { %v74_v52 = vsel %vm256_vm5, %v58_v49, %v71_v51  ;;  %v70_v54 = vsel %vm248_vm4, %v67_v50, %v41_v47 }
  0x8d   :  { %v79_v55 = vrot.slane %v74_v52, 7  ;;  %v84_v56 = vrot.slane %v74_v52, 6  ;;  %v89_v58 = vrot.slane %v74_v52, 1  ;;  %v94_v59 = vrot.slane %v74_v52, 2 }
  0x8e   :  { %v73_v60 = vsel %vm256_vm5, %v57_v53, %v70_v54  ;;  %v99_v1 = vmul.f32 0.40261996, %v74_v52  ;;  %v133_v2 = vmul.f32 0.45710865, %v74_v52 }
  0x8f   :  { %v78_v61 = vrot.slane %v73_v60, 7  ;;  %v83_v62 = vrot.slane %v73_v60, 6  ;;  %v88_v63 = vrot.slane %v73_v60, 1  ;;  %v93_v0 = vrot.slane %v73_v60, 2 }
  0x90   :  { %v98_v16 = vmul.f32 0.40261996, %v73_v60  ;;  %v132_v23 = vmul.f32 0.45710865, %v73_v60 }
  0x91   :  { %v81_v3 = vsel %vm80_vm6, %v78_v61, %v79_v55  ;;  %v82_v4 = vsel %vm80_vm6, %v79_v55, %v78_v61  ;;  %v86_v5 = vsel %vm85_vm7, %v83_v62, %v84_v56  ;;  %v87_v6 = vsel %vm85_vm7, %v84_v56, %v83_v62 }
  0x92   :  { %v91_v8 = vsel %vm90_vm8, %v88_v63, %v89_v58  ;;  %v92_v9 = vsel %vm90_vm8, %v89_v58, %v88_v63  ;;  %v96_v10 = vsel %vm95_vm9, %v93_v0, %v94_v59  ;;  %v97_v11 = vsel %vm95_vm9, %v94_v59, %v93_v0 }
  0x93   :  { %v100_v12 = vadd.f32 %v91_v8, %v82_v4  ;;  %v101_v13 = vadd.f32 %v92_v9, %v81_v3  ;;  %v106_v14 = vadd.f32 %v96_v10, %v87_v6  ;;  %v120_v15 = vsel %vm112_vm10, %v91_v8, %v82_v4 }
  0x94   :  { %v122_v17 = vmul.f32 0.4884027, %v120_v15  ;;  %v136_v19 = vsel %vm114_vm11, %v96_v10, %v87_v6  ;;  %v107_v20 = vadd.f32 %v97_v11, %v86_v5  ;;  %v126_v24 = vsel %vm112_vm10, %v96_v10, %v87_v6 }
  0x95   :  { %v102_v21 = vmul.f32 0.24420135, %v100_v12  ;;  %v103_v22 = vmul.f32 0.24420135, %v101_v13  ;;  %v108_v25 = vmul.f32 0.054488685, %v106_v14 }
  0x96   :  { %v124_v26 = vadd.f32 %v122_v17, %v98_v16  ;;  %v138_v27 = vmul.f32 0.054488685, %v136_v19  ;;  %v109_v28 = vmul.f32 0.054488685, %v107_v20  ;;  %v123_v32 = vmul.f32 0.4884027, %v81_v3 }
  0x97   :  { %v104_v29 = vadd.f32 %v102_v21, %v98_v16  ;;  %v134_v30 = vadd.f32 %v132_v23, %v102_v21  ;;  %v105_v31 = vadd.f32 %v103_v22, %v99_v1  ;;  %v128_v33 = vmul.f32 0.10897737, %v126_v24 }
  0x98   :  { %v129_v34 = vmul.f32 0.10897737, %v86_v5  ;;  %v135_v35 = vadd.f32 %v133_v2, %v103_v22  ;;  %v139_v36 = vmul.f32 0.054488685, %v86_v5  ;;  %v125_v40 = vadd.f32 %v123_v32, %v99_v1 }
  0x99   :  { %v110_v37 = vadd.f32 %v108_v25, %v104_v29  ;;  %v140_v38 = vadd.f32 %v138_v27, %v134_v30  ;;  %v111_v39 = vadd.f32 %v109_v28, %v105_v31  ;;  %v130_v41 = vadd.f32 %v128_v33, %v124_v26 }
  0x9a   :  { %v141_v42 = vadd.f32 %v139_v36, %v135_v35  ;;  %v131_v44 = vadd.f32 %v129_v34, %v125_v40 }
  0x9b   :  { %v144_v43 = vsel %vm114_vm11, %v140_v38, %v110_v37 }
  0x9c   :  { %v148_v45 = vsel %vm112_vm10, %v130_v41, %v144_v43  ;;  %v145_v46 = vsel %vm117_vm12, %v141_v42, %v111_v39 }
  0x9d   :  { %154 = vrot.lane.b32.xlu1 %v148_v45, %s200_s8  ;;  %150 = vrot.lane.b32.xlu2 %v148_v45, %s201_s9  ;;  %v149_v47 = vsel %vm119_vm13, %v131_v44, %v145_v46  ;;  %vm184_vm14 = vcmp.gt.f32.partialorder %v148_v45, 0.3 }
  0x9e   :  { %152 = vrot.lane.b32.xlu0 %v149_v47, %s201_s9  ;;  %vm185_vm1 = vcmp.gt.f32.partialorder %v149_v47, 0.3 }
  0xa5   :  { %156 = vrot.lane.b32.xlu2 %v149_v47, %s200_s8 }
  0xf7   :  { %v151_v48 = vpop.permute.xlu2 %150 }
  0xf8   :  { %v158_v51 = vsel %vm43_vm0, %v148_v45, %v151_v48 }
  0xff   :  { %v157_v49 = vpop.permute.xlu2 %156 }
 0x100   :  { %v161_v54 = vsel %vm46_vm3, %v149_v47, %v157_v49 }
 0x10f   :  { %v155_v50 = vpop.permute.xlu1 %154 }
 0x110   :  { %v160_v52 = vsel %vm46_vm3, %v148_v45, %v155_v50  ;;  %v153_v53 = vpop.permute.xlu0 %152 }
 0x111   :  { %v162_v55 = vmax.f32 %v158_v51, %v160_v52  ;;  %v159_v56 = vsel %vm43_vm0, %v149_v47, %v153_v53 }
 0x112   :  { %v163_v58 = vmax.f32 %v159_v56, %v161_v54 }
 0x113   :  { %v164_v59 = vmax.f32 %v148_v45, %v162_v55 }
 0x114   :  { %v165_v60 = vmax.f32 %v149_v47, %v163_v58 }
 0x115   :  { %v166_v61 = vrot.slane %v164_v59, 7  ;;  %v170_v62 = vrot.slane %v164_v59, 1 }
 0x116   :  { %v167_v63 = vrot.slane %v165_v60, 7  ;;  %v171_v0 = vrot.slane %v165_v60, 1 }
 0x118   :  { %v168_v1 = vsel %vm80_vm6, %v166_v61, %v167_v63  ;;  %v169_v2 = vsel %vm80_vm6, %v167_v63, %v166_v61  ;;  %v172_v3 = vsel %vm90_vm8, %v170_v62, %v171_v0  ;;  %v173_v7 = vsel %vm90_vm8, %v171_v0, %v170_v62 }
 0x119   :  { %v174_v4 = vsel %vm112_vm10, %v164_v59, %v169_v2  ;;  %v177_v5 = vsel %vm119_vm13, %v165_v60, %v173_v7 }
 0x11a   :  { %v178_v6 = vmax.f32 %v174_v4, %v172_v3  ;;  %v179_v8 = vmax.f32 %v168_v1, %v177_v5 }
 0x11c   :  { %v180_v9 = vmax.f32 %v164_v59, %v178_v6  ;;  %v181_v10 = vmax.f32 %v165_v60, %v179_v8 }
 0x11e   :  { %vm182_vm15 = vcmp.eq.f32.partialorder %v148_v45, %v180_v9  ;;  %vm183_vm0 = vcmp.eq.f32.partialorder %v149_v47, %v181_v10 }
 0x11f   :  { %vm186_vm2 = vmand %vm182_vm15, %vm184_vm14 }
 0x120   :  { %vm187_vm3 = vmand %vm183_vm0, %vm185_vm1  ;;  %v188_v11 = vsel %vm186_vm2, %v148_v45, 0.0 }
 0x121   :  { %v189_v12 = vsel %vm187_vm3, %v149_v47, 0.0  ;;  %190 = vst [vmem:[%s340_s1] sm:$0xff] %v188_v11 }
 0x122   :  { %191 = vst [vmem:[%s340_s1 + $0x8] sm:$0xff] %v189_v12 }

</bundles_post_ra>
